<compile_context>
chip_gen: v7x
topology: tpu7x:2x2x1
jax: 0.10.0
libtpu: 0.0.40
codegen_flags: <defaults>
</compile_context>

<pallas_src>
import functools

import jax
import jax.numpy as jnp
from jax.experimental import pallas as pl
from jax.experimental.pallas import tpu as pltpu


# ---------------------------------------------------------------------------
# Kernel
# ---------------------------------------------------------------------------
def _fake_quant_kernel(w_ref, rmin_ref, rmax_ref,
                       wq_ref, scale_ref, nmin_ref, nmax_ref,
                       *, quant_min, quant_max, training, low_precision):
    # Compute dtype: the weight's own bf16 on chips with a bf16 VPU (v6e/v7x)
    # -> 2x elements per vreg on the now-VALU-leaning v7x path; f32 otherwise
    # (f32 weights, or v5e which has no bf16 ALU).
    w = w_ref[...]                                            # (TO, I) native dtype
    wc = w if low_precision else w.astype(jnp.float32)

    # --- Observer (ChannelWiseMinMaxObserver, training branch) ---
    # min/max are exact in any dtype; only the tiny (TO, 1) results go to f32.
    row_min = jnp.min(wc, axis=1, keepdims=True).astype(jnp.float32)
    row_max = jnp.max(wc, axis=1, keepdims=True).astype(jnp.float32)
    if training:
        new_min = jnp.minimum(rmin_ref[...], row_min)
        new_max = jnp.maximum(rmax_ref[...], row_max)
    else:
        new_min = rmin_ref[...]
        new_max = rmax_ref[...]
    nmin_ref[...] = new_min
    nmax_ref[...] = new_max

    # --- Symmetric per-channel scale (zero_point == 0, handled in wrapper) ---
    ranges = jnp.maximum(jnp.abs(new_min), jnp.abs(new_max))  # (TO, 1) f32
    scales = jnp.maximum(ranges / float(quant_max), 1e-8)     # clamp(min=1e-8)
    scale_ref[...] = scales

    # --- Fake quantize ---
    # One exact per-row reciprocal + per-element multiply instead of a
    # per-element divide.
    inv_scales = pl.reciprocal(scales, approx=False)          # (TO, 1) f32
    q = jnp.round(wc * inv_scales.astype(wc.dtype))

    if training:
        # Training merges the fresh row min/max, so range >= |w| for every w in
        # the row and scale >= range/quant_max  =>  |w/scale| <= quant_max even
        # for 1e-8-clamped degenerate rows.  Only the upper bound can be grazed
        # by reciprocal / bf16 rounding noise; the lower clamp
        # (quant_min = -(quant_max + 1)) can never bind.  Keep only the upper.
        q = jnp.minimum(q, float(quant_max))
    else:
        # Eval mode: running min/max need not bound |w| -> full clamp.
        q = jnp.clip(q, float(quant_min), float(quant_max))

    wq_ref[...] = (q * scales.astype(wc.dtype)).astype(wq_ref.dtype)


# ---------------------------------------------------------------------------
# Per-chip configuration & tiling
# ---------------------------------------------------------------------------
def _chip_config():
    """Block/VMEM budget + grid-depth targets + bf16-ALU availability per chip."""
    gen = None
    try:
        kind = jax.devices()[0].device_kind.lower()
        for g in (7, 6, 5, 4, 3, 2):
            if ("v%d" % g) in kind or ("tpu%d" % g) in kind:
                gen = g
                break
    except Exception:
        gen = None
    if gen is not None and gen >= 7:
        # v7x: 64 MiB VMEM, 3.2 TB/s HBM, 2 TensorCores share the parallel grid.
        return dict(target_block_bytes=2 << 20, vmem_limit_bytes=32 << 20,
                    min_steps=8, even_steps=True, bf16_alu=True)
    if gen == 6:
        # v6e: 128 MiB VMEM -> larger blocks amortize per-step overhead.
        return dict(target_block_bytes=4 << 20, vmem_limit_bytes=64 << 20,
                    min_steps=4, even_steps=False, bf16_alu=True)
    if gen is not None and gen <= 5:
        # v5e and older: most HBM-bound, no bf16 VPU -> keep the f32 path.
        return dict(target_block_bytes=4 << 20, vmem_limit_bytes=64 << 20,
                    min_steps=4, even_steps=False, bf16_alu=False)
    # Unknown backend: conservative settings that are valid on every generation.
    return dict(target_block_bytes=2 << 20, vmem_limit_bytes=32 << 20,
                min_steps=4, even_steps=False, bf16_alu=False)


def _align_up(x, a):
    return -(-x // a) * a


def _pick_row_tile(out_channels, in_features, itemsize, *,
                   target_block_bytes, min_steps, even_steps):
    """Pick the per-grid-step row tile for the (row_tile, in_features) w block.

    Goals:
      (a) sublane-aligned for the native dtype (f32: 8, bf16: 16, int8: 32),
      (b) one block <= target_block_bytes (near HBM roofline, VMEM-safe with
          double-buffered in/out blocks),
      (c) >= min_steps grid steps when out_channels allows, so the pipeline
          reaches steady state (prologue fetch / epilogue writeback amortized),
      (d) optionally an even step count (v7x: 2 TensorCores split the grid).
    out_channels need NOT be divisible: the last block is ragged.
    """
    align = max(8, 32 // max(itemsize, 1))
    row_bytes = max(in_features * itemsize, 1)
    # Largest aligned tile under the per-block byte budget.
    tile = max(align, (target_block_bytes // row_bytes) // align * align)
    # Deepen the grid to >= min_steps steps when there are enough rows.
    if out_channels >= min_steps * align:
        tile = min(tile, max(align, (out_channels // min_steps) // align * align))
    # Never exceed the (aligned-up) array itself.
    tile = min(tile, _align_up(out_channels, align))
    if even_steps:
        steps = pl.cdiv(out_channels, tile)
        if steps > 1 and steps % 2 == 1:
            for s in (steps + 1, steps - 1):          # prefer smaller blocks first
                cand = max(align, _align_up(pl.cdiv(out_channels, s), align))
                if pl.cdiv(out_channels, cand) % 2 == 0:
                    tile = cand
                    break
    return tile


# ---------------------------------------------------------------------------
# Wrapper
# ---------------------------------------------------------------------------
def channelwise_fake_quantize(w, min_vals, max_vals, *, bit_width=8,
                              training=True, row_tile=None,
                              donate_weight=False):
    """w: (O, I) in its native dtype; min_vals/max_vals: (O,) f32 running buffers.

    Returns (w_q, scale, zero_point, new_min_vals, new_max_vals), mirroring the
    PyTorch module's output plus its updated observer / scale buffers.
    """
    O, I = w.shape
    quant_min = -2 ** (bit_width - 1)
    quant_max = 2 ** (bit_width - 1) - 1

    cfg = _chip_config()
    itemsize = jnp.dtype(w.dtype).itemsize
    if row_tile is None:
        row_tile = _pick_row_tile(O, I, itemsize,
                                  target_block_bytes=cfg["target_block_bytes"],
                                  min_steps=cfg["min_steps"],
                                  even_steps=cfg["even_steps"])
    num_steps = pl.cdiv(O, row_tile)

    low_precision = bool(cfg["bf16_alu"]) and jnp.dtype(w.dtype) == jnp.bfloat16

    rmin2d = min_vals.reshape(O, 1).astype(jnp.float32)
    rmax2d = max_vals.reshape(O, 1).astype(jnp.float32)

    kernel = functools.partial(_fake_quant_kernel,
                               quant_min=quant_min, quant_max=quant_max,
                               training=training, low_precision=low_precision)

    # Note: if I is not a multiple of 128, main-stream loads/stores become
    # masked (full-dim blocks stay layout-legal); pad I in the caller for peak
    # bandwidth on such shapes.
    w_spec = pl.BlockSpec((row_tile, I), lambda i: (i, 0))
    col_spec = pl.BlockSpec((row_tile, 1), lambda i: (i, 0))

    # Mem-bound streaming op: read w, write w_q, plus tiny per-channel vectors.
    cost = pl.CostEstimate(
        flops=7 * O * I,
        transcendentals=0,
        bytes_accessed=2 * O * I * itemsize + 5 * O * 4)

    call_kwargs = {}
    if donate_weight:
        # Only valid when the caller truly donates w (w_q shares dtype/shape and
        # the per-step block index maps are identical, so block i is read before
        # it is overwritten): reuse w's HBM buffer for w_q.
        call_kwargs["input_output_aliases"] = {0: 0}

    wq, scale2d, nmin2d, nmax2d = pl.pallas_call(
        kernel,
        out_shape=(
            jax.ShapeDtypeStruct((O, I), w.dtype),        # w_q (native dtype)
            jax.ShapeDtypeStruct((O, 1), jnp.float32),    # scale
            jax.ShapeDtypeStruct((O, 1), jnp.float32),    # updated min_vals
            jax.ShapeDtypeStruct((O, 1), jnp.float32),    # updated max_vals
        ),
        grid_spec=pltpu.PrefetchScalarGridSpec(
            num_scalar_prefetch=0,
            grid=(num_steps,),
            in_specs=[w_spec, col_spec, col_spec],
            out_specs=[w_spec, col_spec, col_spec, col_spec],
        ),
        compiler_params=pltpu.CompilerParams(
            dimension_semantics=("parallel",),
            vmem_limit_bytes=cfg["vmem_limit_bytes"]),
        cost_estimate=cost,
        **call_kwargs,
    )(w, rmin2d, rmax2d)

    # zero_point is identically 0; not worth a kernel output / per-step DMA.
    zero_point = jnp.zeros((O,), jnp.float32)
    return (wq, scale2d.reshape(O), zero_point,
            nmin2d.reshape(O), nmax2d.reshape(O))


# ---------------------------------------------------------------------------
# Pure-JAX reference & checks
# ---------------------------------------------------------------------------
def _reference(w, min_vals, max_vals, bit_width=8, training=True):
    quant_min = -2 ** (bit_width - 1)
    quant_max = 2 ** (bit_width - 1) - 1
    if training:
        new_min = jnp.minimum(min_vals, w.min(axis=1))
        new_max = jnp.maximum(max_vals, w.max(axis=1))
    else:
        new_min, new_max = min_vals, max_vals
    ranges = jnp.maximum(jnp.abs(new_min), jnp.abs(new_max))
    scales = jnp.maximum(ranges / float(quant_max), 1e-8)
    s = scales[:, None]
    w_int = jnp.clip(jnp.round(w / s), quant_min, quant_max)
    return w_int * s, scales, new_min, new_max


def _assert_wq_close(wq, ref_wq, ref_scales, *, steps_tol, mismatch_frac=None):
    """w_q must match the reference to within `steps_tol` quant steps per row.

    The exact-reciprocal-then-multiply (and the bf16 fast path on v6e/v7x) can
    shift an integer level by at most one where the quotient sits on a .5
    boundary; everything else must be (fp-noise) exact.
    """
    err = jnp.abs(wq.astype(jnp.float32) - ref_wq)
    bound = steps_tol * ref_scales[:, None] + 1e-6
    assert bool(jnp.all(err <= bound)), "w_q deviates by more than the allowed quant steps"
    if mismatch_frac is not None:
        frac = float(jnp.mean((err > 1e-5 * (1.0 + jnp.abs(ref_wq))).astype(jnp.float32)))
        assert frac <= mismatch_frac, f"too many off-by-one-level elements: {frac}"


if __name__ == "__main__":
    key = jax.random.PRNGKey(0)
    k1, k2, k3, k4, k5 = jax.random.split(key, 5)

    # --- Case 1: small f32 Linear weight, fresh observer (single grid step) ---
    O1, I1 = 8, 32
    w1 = jax.random.normal(k1, (O1, I1), dtype=jnp.float32)
    mn1 = jnp.full((O1,), jnp.inf, dtype=jnp.float32)
    mx1 = jnp.full((O1,), -jnp.inf, dtype=jnp.float32)
    wq1, s1, zp1, nmin1, nmax1 = channelwise_fake_quantize(w1, mn1, mx1)
    jax.block_until_ready(wq1)
    rq1, rs1, rn1, rx1 = _reference(w1, mn1, mx1)
    _assert_wq_close(wq1, rq1, rs1, steps_tol=1.0)
    assert jnp.allclose(s1, rs1, rtol=1e-6, atol=1e-9)
    assert jnp.allclose(zp1, jnp.zeros_like(zp1))
    assert jnp.allclose(nmin1, rn1) and jnp.allclose(nmax1, rx1)

    # --- Case 2: multi-step grid + non-trivial running buffers ---
    O2, I2 = 256, 512
    w2 = jax.random.normal(k2, (O2, I2), dtype=jnp.float32)
    mn2 = jnp.full((O2,), -0.5, dtype=jnp.float32)
    mx2 = jnp.full((O2,), 0.75, dtype=jnp.float32)
    wq2, s2, _, nmin2, nmax2 = channelwise_fake_quantize(w2, mn2, mx2)
    jax.block_until_ready(wq2)
    rq2, rs2, rn2, rx2 = _reference(w2, mn2, mx2)
    _assert_wq_close(wq2, rq2, rs2, steps_tol=1.0, mismatch_frac=1e-3)
    assert jnp.allclose(s2, rs2, rtol=1e-6, atol=1e-9)
    assert jnp.allclose(nmin2, rn2) and jnp.allclose(nmax2, rx2)

    # --- Case 3: native bf16 weights stay bf16 in HBM (bf16 fast path on v6e/v7x) ---
    O3, I3 = 32, 128
    w3 = jax.random.normal(k3, (O3, I3), dtype=jnp.float32).astype(jnp.bfloat16)
    mn3 = jnp.full((O3,), jnp.inf, dtype=jnp.float32)
    mx3 = jnp.full((O3,), -jnp.inf, dtype=jnp.float32)
    wq3, s3, _, nmin3, nmax3 = channelwise_fake_quantize(w3, mn3, mx3)
    jax.block_until_ready(wq3)
    w3f = w3.astype(jnp.float32)
    rq3, rs3, rn3, rx3 = _reference(w3f, mn3, mx3)
    assert wq3.dtype == jnp.bfloat16
    _assert_wq_close(wq3, rq3, rs3, steps_tol=1.75)   # <=1 level + bf16 store rounding
    assert jnp.allclose(s3, rs3, rtol=1e-6, atol=1e-9)
    assert jnp.allclose(nmin3, rn3) and jnp.allclose(nmax3, rx3)

    # --- Case 4: ragged grid (O not a multiple of the tile) ---
    O4, I4 = 100, 256
    w4 = jax.random.normal(k4, (O4, I4), dtype=jnp.float32)
    mn4 = jnp.full((O4,), -0.25, dtype=jnp.float32)
    mx4 = jnp.full((O4,), 0.25, dtype=jnp.float32)
    wq4, s4, _, nmin4, nmax4 = channelwise_fake_quantize(w4, mn4, mx4)
    jax.block_until_ready(wq4)
    rq4, rs4, rn4, rx4 = _reference(w4, mn4, mx4)
    _assert_wq_close(wq4, rq4, rs4, steps_tol=1.0, mismatch_frac=1e-3)
    assert jnp.allclose(s4, rs4, rtol=1e-6, atol=1e-9)
    assert jnp.allclose(nmin4, rn4) and jnp.allclose(nmax4, rx4)

    # --- Case 5: eval mode (training=False) -> observer frozen, full clamp ---
    O5, I5 = 16, 64
    w5 = 3.0 * jax.random.normal(k5, (O5, I5), dtype=jnp.float32)
    mn5 = jnp.full((O5,), -2.0, dtype=jnp.float32)
    mx5 = jnp.full((O5,), 2.0, dtype=jnp.float32)
    wq5, s5, _, nmin5, nmax5 = channelwise_fake_quantize(w5, mn5, mx5, training=False)
    jax.block_until_ready(wq5)
    rq5, rs5, rn5, rx5 = _reference(w5, mn5, mx5, training=False)
    _assert_wq_close(wq5, rq5, rs5, steps_tol=1.0)
    assert jnp.allclose(s5, rs5, rtol=1e-6, atol=1e-9)
    assert jnp.allclose(nmin5, rn5) and jnp.allclose(nmax5, rx5)

    print("KERNEL_OK")
</pallas_src>

<mosaic_0001>
module attributes {stable_mosaic.version = 11 : i64} {
  func.func @_fake_quant_kernel(%arg0: i32, %arg1: memref<8x32xf32, #tpu.memory_space<vmem>>, %arg2: memref<8x1xf32, #tpu.memory_space<vmem>>, %arg3: memref<8x1xf32, #tpu.memory_space<vmem>>, %arg4: memref<8x32xf32, #tpu.memory_space<vmem>>, %arg5: memref<8x1xf32, #tpu.memory_space<vmem>>, %arg6: memref<8x1xf32, #tpu.memory_space<vmem>>, %arg7: memref<8x1xf32, #tpu.memory_space<vmem>>) attributes {dimension_semantics = [#tpu.dimension_semantics<parallel>], iteration_bounds = array<i64: 1>, scalar_prefetch = 0 : i64, scratch_operands = 0 : i64, tpu.core_type = #tpu.core_type<tc>, window_params = [{transform_indices = @transform_0, window_bounds = array<i64: 8, 32>}, {transform_indices = @transform_1, window_bounds = array<i64: 8, 1>}, {transform_indices = @transform_2, window_bounds = array<i64: 8, 1>}, {transform_indices = @transform_3, window_bounds = array<i64: 8, 32>}, {transform_indices = @transform_4, window_bounds = array<i64: 8, 1>}, {transform_indices = @transform_5, window_bounds = array<i64: 8, 1>}, {transform_indices = @transform_6, window_bounds = array<i64: 8, 1>}]} {
    %c0 = arith.constant 0 : index
    %c0_0 = arith.constant 0 : index
    %0 = vector.load %arg1[%c0, %c0_0] : memref<8x32xf32, #tpu.memory_space<vmem>>, vector<8x32xf32>
    %cst = arith.constant dense<0x7F800000> : vector<8xf32>
    %1 = vector.multi_reduction <minimumf>, %0, %cst [1] : vector<8x32xf32> to vector<8xf32>
    %2 = vector.shape_cast %1 : vector<8xf32> to vector<8x1xf32>
    %cst_1 = arith.constant dense<0xFF800000> : vector<8xf32>
    %3 = vector.multi_reduction <maximumf>, %0, %cst_1 [1] : vector<8x32xf32> to vector<8xf32>
    %4 = vector.shape_cast %3 : vector<8xf32> to vector<8x1xf32>
    %c0_2 = arith.constant 0 : index
    %c0_3 = arith.constant 0 : index
    %5 = vector.load %arg2[%c0_2, %c0_3] : memref<8x1xf32, #tpu.memory_space<vmem>>, vector<8x1xf32>
    %6 = arith.minimumf %5, %2 : vector<8x1xf32>
    %c0_4 = arith.constant 0 : index
    %c0_5 = arith.constant 0 : index
    %7 = vector.load %arg3[%c0_4, %c0_5] : memref<8x1xf32, #tpu.memory_space<vmem>>, vector<8x1xf32>
    %8 = arith.maximumf %7, %4 : vector<8x1xf32>
    %c0_6 = arith.constant 0 : index
    %c0_7 = arith.constant 0 : index
    %9 = vector.load %arg6[%c0_6, %c0_7] : memref<8x1xf32, #tpu.memory_space<vmem>>, vector<8x1xf32>
    tpu.vector_store %arg6[%c0_6, %c0_7], %6 {strides = array<i32>} : memref<8x1xf32, #tpu.memory_space<vmem>>, vector<8x1xf32>,
    %c0_8 = arith.constant 0 : index
    %c0_9 = arith.constant 0 : index
    %10 = vector.load %arg7[%c0_8, %c0_9] : memref<8x1xf32, #tpu.memory_space<vmem>>, vector<8x1xf32>
    tpu.vector_store %arg7[%c0_8, %c0_9], %8 {strides = array<i32>} : memref<8x1xf32, #tpu.memory_space<vmem>>, vector<8x1xf32>,
    %11 = math.absf %6 : vector<8x1xf32>
    %12 = math.absf %8 : vector<8x1xf32>
    %13 = arith.maximumf %11, %12 : vector<8x1xf32>
    %cst_10 = arith.constant 1.270000e+02 : f32
    %14 = vector.broadcast %cst_10 : f32 to vector<8x1xf32>
    %15 = arith.divf %13, %14 : vector<8x1xf32>
    %cst_11 = arith.constant 9.99999993E-9 : f32
    %16 = vector.broadcast %cst_11 : f32 to vector<8x1xf32>
    %17 = arith.maximumf %15, %16 : vector<8x1xf32>
    %c0_12 = arith.constant 0 : index
    %c0_13 = arith.constant 0 : index
    %18 = vector.load %arg5[%c0_12, %c0_13] : memref<8x1xf32, #tpu.memory_space<vmem>>, vector<8x1xf32>
    tpu.vector_store %arg5[%c0_12, %c0_13], %17 {strides = array<i32>} : memref<8x1xf32, #tpu.memory_space<vmem>>, vector<8x1xf32>,
    %19 = tpu.reciprocal %17 : vector<8x1xf32> -> vector<8x1xf32>
    %20 = vector.broadcast %19 : vector<8x1xf32> to vector<8x32xf32>
    %21 = arith.mulf %0, %20 : vector<8x32xf32>
    %22 = math.roundeven %21 : vector<8x32xf32>
    %cst_14 = arith.constant 1.270000e+02 : f32
    %23 = vector.broadcast %cst_14 : f32 to vector<8x32xf32>
    %24 = arith.minimumf %22, %23 : vector<8x32xf32>
    %25 = vector.broadcast %17 : vector<8x1xf32> to vector<8x32xf32>
    %26 = arith.mulf %24, %25 : vector<8x32xf32>
    %c0_15 = arith.constant 0 : index
    %c0_16 = arith.constant 0 : index
    %27 = vector.load %arg4[%c0_15, %c0_16] : memref<8x32xf32, #tpu.memory_space<vmem>>, vector<8x32xf32>
    tpu.vector_store %arg4[%c0_15, %c0_16], %26 {strides = array<i32>} : memref<8x32xf32, #tpu.memory_space<vmem>>, vector<8x32xf32>,
    return
  }
  func.func @transform_0(%arg0: i32) -> (i32, i32) {
    %c0_i32 = arith.constant 0 : i32
    %c0_i32_0 = arith.constant 0 : i32
    return %arg0, %c0_i32 : i32, i32
  }
  func.func @transform_1(%arg0: i32) -> (i32, i32) {
    %c0_i32 = arith.constant 0 : i32
    %c0_i32_0 = arith.constant 0 : i32
    return %arg0, %c0_i32 : i32, i32
  }
  func.func @transform_2(%arg0: i32) -> (i32, i32) {
    %c0_i32 = arith.constant 0 : i32
    %c0_i32_0 = arith.constant 0 : i32
    return %arg0, %c0_i32 : i32, i32
  }
  func.func @transform_3(%arg0: i32) -> (i32, i32) {
    %c0_i32 = arith.constant 0 : i32
    %c0_i32_0 = arith.constant 0 : i32
    return %arg0, %c0_i32 : i32, i32
  }
  func.func @transform_4(%arg0: i32) -> (i32, i32) {
    %c0_i32 = arith.constant 0 : i32
    %c0_i32_0 = arith.constant 0 : i32
    return %arg0, %c0_i32 : i32, i32
  }
  func.func @transform_5(%arg0: i32) -> (i32, i32) {
    %c0_i32 = arith.constant 0 : i32
    %c0_i32_0 = arith.constant 0 : i32
    return %arg0, %c0_i32 : i32, i32
  }
  func.func @transform_6(%arg0: i32) -> (i32, i32) {
    %c0_i32 = arith.constant 0 : i32
    %c0_i32_0 = arith.constant 0 : i32
    return %arg0, %c0_i32 : i32, i32
  }
}

</mosaic_0001>

<bundles_post_ra>
// kernel: tpu_custom_call.1
= control target key start
LH: loop header
LB: loop body
LE: loop exit
PB: predicated region body
PF: predicated region fallthrough
CT: control target
= control target key end

     0   :  { %vm20_vm0 = vcmask 261120   ;;  %s184_s0 = inlined_call_operand.vmem [shape: f32[8,32], index: 0, kind: input, shape index: {}]   ;;  %s185_s1 = inlined_call_operand.vmem [shape: f32[8,1], index: 1, kind: input, shape index: {}]   ;;  %s186_s2 = inlined_call_operand.vmem [shape: f32[8,1], index: 2, kind: input, shape index: {}]   ;;  %s187_s3 = inlined_call_operand.hbm [shape: f32[8,32], index: 3, kind: output, shape index: {0}]   ;;  %s188_s4 = inlined_call_operand.vmem [shape: f32[8,1], index: 4, kind: output, shape index: {1}]   ;;  %s189_s5 = inlined_call_operand.vmem [shape: f32[8,1], index: 5, kind: output, shape index: {2}]   ;;  %s190_s6 = inlined_call_operand.vmem [shape: f32[8,1], index: 6, kind: output, shape index: {3}]  }
   0x1   :  { %v19_v0 = vld [vmem:[%s184_s0] sm:$0xff] }
   0x2   :  { %12 = vsyncpa [#allocation3], 0  ;;  %v21_v1 = vsel %vm20_vm0, %v19_v0, inf  ;;  %v24_v2 = vsel %vm20_vm0, %v19_v0, -inf  ;;  %v114_v3 = vmov 0   ;;  %v27_v4 = vld [vmem:[%s185_s1] sm:$0xff] }
   0x3   :  { %22 = vmin.xlane.f32.xlu0 %v21_v1  ;;  %86 = vset.pattern.permute.xlu1 %v114_v3  ;;  %vm31_vm1 = vcmask 7168   ;;  %v29_v7 = vld [vmem:[%s186_s2] sm:$0xff]  ;;  %s115_s2 = smov [#allocation2]  }
   0x4   :  { %87 = vset.pattern.permute.xlu0 %v114_v3 }
   0x7   :  { %25 = vmax.xlane.f32.xlu0 %v24_v2 }
  0x90   :  { %v23_v5 = vpop.xlane.xlu0 %22 }
  0x91   :  { %v28_v6 = vmin.f32 %v27_v4, %v23_v5 }
  0x93   :  { %32 = vst.msk [vmem:[%s189_s5] sm:$0xff] %vm31_vm1, %v28_v6  ;;  %v34_v10 = vand.u32 2147483647, %v28_v6  ;;  %s63_s5 = sshll.u32 %s115_s2, 4  ;;  %s64_s5 = int_to_ptr.vmem [resolvable:$true] %s63_s5 }
  0x94   :  { %v26_v8 = vpop.xlane.xlu0 %25  ;;  %p95_p1 = scmp.lt.s32.totalorder %s64_s5, %s64_s5 }
  0x95   :  { %v30_v9 = vmax.f32 %v29_v7, %v26_v8 }
  0x97   :  { %33 = vst.msk [vmem:[%s190_s6] sm:$0xff] %vm31_vm1, %v30_v9  ;;  %v35_v11 = vand.u32 2147483647, %v30_v9  ;;  %s90_s6 = scalar_lea.vmem %s64_s5, 128 }
  0x98   :  { %p91_p0 = scmp.ne.s32.totalorder %s64_s5, %s90_s6  ;;  %p96_p2 = scmp.lt.s32.totalorder %s90_s6, %s90_s6 }
  0x99   :  { %v36_v12 = vmax.f32.f32 %v34_v10, %v35_v11 }
  0x9a   :  { %p97_p3 = por %p96_p2, %p95_p1 }
  0x9b   :  { %v38_v13 = vmul.f32 0.007874016, %v36_v12 }
  0x9c   :  { %p98_p4 = pnand %p97_p3, %p91_p0 }
  0x9d   :  { %v39_v14 = vmax.f32 %v38_v13, 1e-08 }
  0x9f   :  { %40 = vst.msk [vmem:[%s188_s4] sm:$0xff] %vm31_vm1, %v39_v14  ;;  %88 = vrcp.f32 %v39_v14 }
  0xa9   :  { %v89_v15 = vpop.eup %88 }
  0xaa   :  { %44 = vperm.xlu1 %86, %v89_v15  }
  0xae   :  { %52 = vperm.xlu1 %86, %v39_v14  }
 0x129   :  { %v45_v16 = vpop.permute.xlu1 %44 }
 0x12a   :  { %v47_v17 = vmul.f32 %v45_v16, %v19_v0 }
 0x12c   :  { %v83_v18 = vround.rtne.f32 %v47_v17 }
 0x12d   :  { %v53_v20 = vpop.permute.xlu1 %52 }
 0x12e   :  { %v49_v19 = vmin.f32 %v83_v18, 127.0 }
 0x130   :  { %v55_v21 = vmul.f32 %v53_v20, %v49_v19 }
 0x132   :  { %56 = vst.msk [vmem:[#allocation2] sm:$0xff] %vm20_vm0, %v55_v21 }
 0x133   :  { %101 = shalt.err (!%p98_p4)
}
 0x134   :  { %s102_s8 = scalar_lea.hbm %s187_s3, 128 }
 0x135   :  { %p103_p5 = scmp.ne.s32.totalorder %s187_s3, %s102_s8  ;;  %p106_p6 = scmp.lt.u32.totalorder %s102_s8, %s187_s3 }
 0x137   :  { %p108_p7 = pnand %p106_p6, %p103_p5 }
 0x139   :  { %111 = shalt.err (!%p108_p7)
}
 0x13a   :  { %66 = dma.vmem_to_hbm [thread:$0]  %s64_s5, 128, %s187_s3, [#allocation3]  }
 0x13b   :  { %112 = dma.done.wait [#allocation3], 128  }
 0x13c   :  { %113 = vsyncadd [#allocation3], 4294967168 }
 0x13d   :  { %82 = vsyncpa [#allocation3], 1 }

</bundles_post_ra>
